<compile_context>
chip_gen: v7x
topology: tpu7x:2x2x1
jax: 0.10.0
libtpu: 0.0.40
codegen_flags: <defaults>
</compile_context>

<pallas_src>
import jax
import jax.numpy as jnp
from jax.experimental import pallas as pl
from jax.experimental.pallas import tpu as pltpu


def _round_up(v, m):
    return (v + m - 1) // m * m


def _qrdqn_kernel(x_ref, w1_ref, b1_ref, w2_ref, b2_ref, out_ref):
    # Layer 1: bf16 operands on the MXU, f32 accumulation.
    h = jnp.dot(x_ref[...], w1_ref[...], preferred_element_type=jnp.float32)
    # Bias add (VPU) + tanh (EUP) in f32.
    h = jnp.tanh(h + b1_ref[...])
    # Layer 2: cast activations back to bf16 for the MXU, accumulate in f32.
    o = jnp.dot(h.astype(jnp.bfloat16), w2_ref[...],
                preferred_element_type=jnp.float32)
    out_ref[...] = (o + b2_ref[...]).astype(out_ref.dtype)


def qrdqn_forward(x, w1, b1, w2, b2, action_dim, num_quant, *, max_tb=1024):
    """Pallas implementation of QRDQN_Model.forward.

    x:  (B, state_dim) float32
    w1: (state_dim, 256), b1: (256,)
    w2: (256, action_dim*num_quant), b2: (action_dim*num_quant,)
    returns: (B, action_dim, num_quant) float32
    """
    B, S = x.shape
    H = w1.shape[1]
    OUT = w2.shape[1]
    assert OUT == action_dim * num_quant

    # --- Lane-pad the output feature dim to a multiple of 128 (lane-dense
    # stores); extra columns are zero and sliced off after the kernel.
    OUT_pad = _round_up(OUT, 128)
    if OUT_pad != OUT:
        w2 = jnp.pad(w2, ((0, 0), (0, OUT_pad - OUT)))
        b2 = jnp.pad(b2, (0, OUT_pad - OUT))

    # --- Batch tile: multiple of 16 (bf16 sublane packing), capped so
    # double-buffered tiles + f32 hidden fit comfortably in scoped VMEM on
    # every TPU generation. Pad B to a multiple of TB; padded rows are sliced
    # off afterwards.
    TB = min(max_tb, _round_up(B, 16))
    B_pad = _round_up(B, TB)
    if B_pad != B:
        x = jnp.pad(x, ((0, B_pad - B), (0, 0)))

    # --- bf16 MXU operands; biases stay f32 for the elementwise path.
    x_bf = x.astype(jnp.bfloat16)
    w1_bf = w1.astype(jnp.bfloat16)
    w2_bf = w2.astype(jnp.bfloat16)
    b1_2d = b1.reshape(1, H).astype(jnp.float32)
    b2_2d = b2.reshape(1, OUT_pad).astype(jnp.float32)

    grid = (B_pad // TB,)

    flops = 2 * B_pad * (S * H + H * OUT_pad)
    bytes_accessed = (
        x_bf.size * 2 + w1_bf.size * 2 + w2_bf.size * 2
        + b1_2d.size * 4 + b2_2d.size * 4 + B_pad * OUT_pad * 4
    )

    out_flat = pl.pallas_call(
        _qrdqn_kernel,
        out_shape=jax.ShapeDtypeStruct((B_pad, OUT_pad), jnp.float32),
        grid=grid,
        in_specs=[
            pl.BlockSpec((TB, S), lambda i: (i, 0)),       # x: streamed per tile
            pl.BlockSpec((S, H), lambda i: (0, 0)),        # w1: resident
            pl.BlockSpec((1, H), lambda i: (0, 0)),        # b1: resident
            pl.BlockSpec((H, OUT_pad), lambda i: (0, 0)),  # w2: resident
            pl.BlockSpec((1, OUT_pad), lambda i: (0, 0)),  # b2: resident
        ],
        out_specs=pl.BlockSpec((TB, OUT_pad), lambda i: (i, 0)),
        compiler_params=pltpu.CompilerParams(
            # Batch tiles are independent -> shard across TCs on v7x megacore.
            dimension_semantics=("parallel",),
            vmem_limit_bytes=32 * 1024 * 1024,
        ),
        cost_estimate=pl.CostEstimate(
            flops=flops,
            transcendentals=B_pad * H,
            bytes_accessed=bytes_accessed,
        ),
    )(x_bf, w1_bf, b1_2d, w2_bf, b2_2d)

    # Drop padding, then view(-1, action_dim, num_quant) as in the module.
    return out_flat[:B, :OUT].reshape(-1, action_dim, num_quant)


def _init_params(key, state_dim, hidden, out_dim):
    # Deterministic, PyTorch-Linear-style uniform init: U(-1/sqrt(fan_in), +).
    k1, k2, k3, k4 = jax.random.split(key, 4)
    bnd1 = 1.0 / jnp.sqrt(state_dim)
    bnd2 = 1.0 / jnp.sqrt(hidden)
    w1 = jax.random.uniform(k1, (state_dim, hidden), jnp.float32, -bnd1, bnd1)
    b1 = jax.random.uniform(k2, (hidden,), jnp.float32, -bnd1, bnd1)
    w2 = jax.random.uniform(k3, (hidden, out_dim), jnp.float32, -bnd2, bnd2)
    b2 = jax.random.uniform(k4, (out_dim,), jnp.float32, -bnd2, bnd2)
    return w1, b1, w2, b2


def _reference(x, w1, b1, w2, b2, action_dim, num_quant):
    return (jnp.tanh(x @ w1 + b1) @ w2 + b2).reshape(-1, action_dim, num_quant)


if __name__ == "__main__":
    hidden = 256
    key = jax.random.PRNGKey(0)

    # Case 1: lane-aligned output (action_dim*num_quant = 128).
    batch, state_dim, action_dim, num_quant = 8, 32, 4, 32
    kx, kp, key = jax.random.split(key, 3)
    x = jax.random.normal(kx, (batch, state_dim), dtype=jnp.float32)
    w1, b1, w2, b2 = _init_params(kp, state_dim, hidden, action_dim * num_quant)
    out = jax.block_until_ready(
        qrdqn_forward(x, w1, b1, w2, b2, action_dim, num_quant))
    ref = _reference(x, w1, b1, w2, b2, action_dim, num_quant)
    assert out.shape == (batch, action_dim, num_quant)
    assert jnp.allclose(out, ref, atol=2e-2, rtol=2e-2)

    # Case 2: typical QR-DQN config with non-lane-aligned output
    # (exercises the 128-lane zero-padding path and batch padding).
    batch2, action_dim2, num_quant2 = 5, 3, 51
    kx2, kp2 = jax.random.split(key)
    x2 = jax.random.normal(kx2, (batch2, state_dim), dtype=jnp.float32)
    w1b, b1b, w2b, b2b = _init_params(kp2, state_dim, hidden,
                                      action_dim2 * num_quant2)
    out2 = jax.block_until_ready(
        qrdqn_forward(x2, w1b, b1b, w2b, b2b, action_dim2, num_quant2))
    ref2 = _reference(x2, w1b, b1b, w2b, b2b, action_dim2, num_quant2)
    assert out2.shape == (batch2, action_dim2, num_quant2)
    assert jnp.allclose(out2, ref2, atol=2e-2, rtol=2e-2)

    print("KERNEL_OK")
</pallas_src>

<mosaic_0001>
module attributes {stable_mosaic.version = 11 : i64} {
  func.func @_qrdqn_kernel(%arg0: i32, %arg1: memref<16x32xbf16, #tpu.memory_space<vmem>>, %arg2: memref<32x256xbf16, #tpu.memory_space<vmem>>, %arg3: memref<1x256xf32, #tpu.memory_space<vmem>>, %arg4: memref<256x128xbf16, #tpu.memory_space<vmem>>, %arg5: memref<1x128xf32, #tpu.memory_space<vmem>>, %arg6: memref<16x128xf32, #tpu.memory_space<vmem>>) attributes {dimension_semantics = [#tpu.dimension_semantics<parallel>], iteration_bounds = array<i64: 1>, scalar_prefetch = 0 : i64, scratch_operands = 0 : i64, tpu.core_type = #tpu.core_type<tc>, window_params = [{transform_indices = @transform_0, window_bounds = array<i64: 16, 32>}, {pipeline_mode = #tpu.pipeline_mode<synchronous>, transform_indices = @transform_1, window_bounds = array<i64: 32, 256>}, {pipeline_mode = #tpu.pipeline_mode<synchronous>, transform_indices = @transform_2, window_bounds = array<i64: 1, 256>}, {pipeline_mode = #tpu.pipeline_mode<synchronous>, transform_indices = @transform_3, window_bounds = array<i64: 256, 128>}, {pipeline_mode = #tpu.pipeline_mode<synchronous>, transform_indices = @transform_4, window_bounds = array<i64: 1, 128>}, {transform_indices = @transform_5, window_bounds = array<i64: 16, 128>}]} {
    %c0 = arith.constant 0 : index
    %c0_0 = arith.constant 0 : index
    %0 = vector.load %arg1[%c0, %c0_0] : memref<16x32xbf16, #tpu.memory_space<vmem>>, vector<16x32xbf16>
    %c0_1 = arith.constant 0 : index
    %c0_2 = arith.constant 0 : index
    %1 = vector.load %arg2[%c0_1, %c0_2] : memref<32x256xbf16, #tpu.memory_space<vmem>>, vector<32x256xbf16>
    %cst = arith.constant dense<0.000000e+00> : vector<16x256xf32>
    %2 = tpu.matmul %0, %1, %cst {dimension_numbers = #tpu.dot_dimension_numbers<[1], [0], [0], [1], [0, 0, 1, 1], [], []>} : vector<16x32xbf16>, vector<32x256xbf16>, vector<16x256xf32> -> vector<16x256xf32>
    %c0_3 = arith.constant 0 : index
    %c0_4 = arith.constant 0 : index
    %3 = vector.load %arg3[%c0_3, %c0_4] : memref<1x256xf32, #tpu.memory_space<vmem>>, vector<1x256xf32>
    %4 = vector.broadcast %3 : vector<1x256xf32> to vector<16x256xf32>
    %5 = arith.addf %2, %4 : vector<16x256xf32>
    %6 = math.tanh %5 : vector<16x256xf32>
    %7 = arith.truncf %6 : vector<16x256xf32> to vector<16x256xbf16>
    %c0_5 = arith.constant 0 : index
    %c0_6 = arith.constant 0 : index
    %8 = vector.load %arg4[%c0_5, %c0_6] : memref<256x128xbf16, #tpu.memory_space<vmem>>, vector<256x128xbf16>
    %cst_7 = arith.constant dense<0.000000e+00> : vector<16x128xf32>
    %9 = tpu.matmul %7, %8, %cst_7 {dimension_numbers = #tpu.dot_dimension_numbers<[1], [0], [0], [1], [0, 0, 1, 1], [], []>} : vector<16x256xbf16>, vector<256x128xbf16>, vector<16x128xf32> -> vector<16x128xf32>
    %c0_8 = arith.constant 0 : index
    %c0_9 = arith.constant 0 : index
    %10 = vector.load %arg5[%c0_8, %c0_9] : memref<1x128xf32, #tpu.memory_space<vmem>>, vector<1x128xf32>
    %11 = vector.broadcast %10 : vector<1x128xf32> to vector<16x128xf32>
    %12 = arith.addf %9, %11 : vector<16x128xf32>
    %c0_10 = arith.constant 0 : index
    %c0_11 = arith.constant 0 : index
    %13 = vector.load %arg6[%c0_10, %c0_11] : memref<16x128xf32, #tpu.memory_space<vmem>>, vector<16x128xf32>
    tpu.vector_store %arg6[%c0_10, %c0_11], %12 {strides = array<i32>} : memref<16x128xf32, #tpu.memory_space<vmem>>, vector<16x128xf32>,
    return
  }
  func.func @transform_0(%arg0: i32) -> (i32, i32) {
    %c0_i32 = arith.constant 0 : i32
    %c0_i32_0 = arith.constant 0 : i32
    return %arg0, %c0_i32 : i32, i32
  }
  func.func @transform_1(%arg0: i32) -> (i32, i32) {
    %c0_i32 = arith.constant 0 : i32
    %c0_i32_0 = arith.constant 0 : i32
    %c0_i32_1 = arith.constant 0 : i32
    return %c0_i32, %c0_i32_0 : i32, i32
  }
  func.func @transform_2(%arg0: i32) -> (i32, i32) {
    %c0_i32 = arith.constant 0 : i32
    %c0_i32_0 = arith.constant 0 : i32
    %c0_i32_1 = arith.constant 0 : i32
    return %c0_i32, %c0_i32_0 : i32, i32
  }
  func.func @transform_3(%arg0: i32) -> (i32, i32) {
    %c0_i32 = arith.constant 0 : i32
    %c0_i32_0 = arith.constant 0 : i32
    %c0_i32_1 = arith.constant 0 : i32
    return %c0_i32, %c0_i32_0 : i32, i32
  }
  func.func @transform_4(%arg0: i32) -> (i32, i32) {
    %c0_i32 = arith.constant 0 : i32
    %c0_i32_0 = arith.constant 0 : i32
    %c0_i32_1 = arith.constant 0 : i32
    return %c0_i32, %c0_i32_0 : i32, i32
  }
  func.func @transform_5(%arg0: i32) -> (i32, i32) {
    %c0_i32 = arith.constant 0 : i32
    %c0_i32_0 = arith.constant 0 : i32
    return %arg0, %c0_i32 : i32, i32
  }
}

</mosaic_0001>

<bundles_post_ra>
// kernel: tpu_custom_call.1
= control target key start
LH: loop header
LB: loop body
LE: loop exit
PB: predicated region body
PF: predicated region fallthrough
CT: control target
= control target key end

     0   :  { %10 = vsyncpa [#allocation3], 0  ;;  %s633_s0 = inlined_call_operand.hbm [shape: bf16[16,32], index: 0, kind: input, shape index: {}]   ;;  %s634_s1 = inlined_call_operand.hbm [shape: bf16[32,256], index: 1, kind: input, shape index: {}]   ;;  %s635_s2 = inlined_call_operand.vmem [shape: f32[1,256], index: 2, kind: input, shape index: {}]   ;;  %s636_s3 = inlined_call_operand.hbm [shape: bf16[256,128], index: 3, kind: input, shape index: {}]   ;;  %s637_s4 = inlined_call_operand.vmem [shape: f32[1,128], index: 4, kind: input, shape index: {}]   ;;  %s638_s5 = inlined_call_operand.hbm [shape: f32[16,128], index: 5, kind: output, shape index: {}]  }
   0x1   :  { %11 = vsyncpa [#allocation6], 0 }
   0x2   :  { %12 = vsyncpa [#allocation4], 0  ;;  %s534_s18 = smov [#allocation5]   ;;  %s440_s22 = scalar_lea.hbm %s634_s1, 512 }
   0x3   :  { %s30_s19 = sshll.u32 %s534_s18, 4  ;;  %p441_p0 = scmp.ne.s32.totalorder %s634_s1, %s440_s22  ;;  %s31_s19 = int_to_ptr.vmem [resolvable:$true] %s30_s19 }
   0x4   :  { %p444_p1 = scmp.lt.u32.totalorder %s440_s22, %s634_s1 }
   0x6   :  { %p446_p2 = pnand %p444_p1, %p441_p0 }
   0x8   :  { %449 = shalt.err (!%p446_p2)
}
   0x9   :  { %s450_s27 = scalar_lea.vmem %s31_s19, 512  ;;  %p455_p4 = scmp.lt.s32.totalorder %s31_s19, %s31_s19 }
   0xa   :  { %p451_p3 = scmp.ne.s32.totalorder %s31_s19, %s450_s27  ;;  %p456_p5 = scmp.lt.s32.totalorder %s450_s27, %s450_s27 }
   0xc   :  { %p457_p6 = por %p456_p5, %p455_p4 }
   0xe   :  { %p458_p7 = pnand %p457_p6, %p451_p3 }
  0x10   :  { %461 = shalt.err (!%p458_p7)
}
  0x11   :  { %s535_s28 = smov 128   ;;  %s536_s29 = smov 8  }
  0x12   :  { %36 = dma.hbm_to_vmem [thread:$0]  %s634_s1, 512, %s31_s19, [#allocation6], %s535_s28, %s535_s28, %s536_s29  }
  0x13   :  { %s537_s7 = smov [#allocation2]   ;;  %s462_s11 = scalar_lea.hbm %s633_s0, 128 }
  0x14   :  { %s18_s8 = sshll.u32 %s537_s7, 4  ;;  %p463_p8 = scmp.ne.s32.totalorder %s633_s0, %s462_s11  ;;  %s19_s8 = int_to_ptr.vmem [resolvable:$true] %s18_s8 }
  0x15   :  { %p466_p9 = scmp.lt.u32.totalorder %s462_s11, %s633_s0 }
  0x17   :  { %p468_p10 = pnand %p466_p9, %p463_p8 }
  0x19   :  { %471 = shalt.err (!%p468_p10)
}
  0x1a   :  { %s472_s16 = scalar_lea.vmem %s19_s8, 128  ;;  %p477_p12 = scmp.lt.s32.totalorder %s19_s8, %s19_s8 }
  0x1b   :  { %p473_p11 = scmp.ne.s32.totalorder %s19_s8, %s472_s16  ;;  %p478_p13 = scmp.lt.s32.totalorder %s472_s16, %s472_s16 }
  0x1d   :  { %p479_p0 = por %p478_p13, %p477_p12 }
  0x1f   :  { %p480_p1 = pnand %p479_p0, %p473_p11 }
  0x21   :  { %483 = shalt.err (!%p480_p1)
}
  0x22   :  { %s538_s1 = smov 64   ;;  %s539_s17 = smov 4  }
  0x23   :  { %24 = dma.hbm_to_vmem [thread:$0]  %s633_s0, 128, %s19_s8, [#allocation3], %s538_s1, %s538_s1, %s539_s17  }
  0x24   :  { %s540_s20 = smov [#allocation7]   ;;  %s484_s24 = scalar_lea.hbm %s636_s3, 2048 }
  0x25   :  { %s44_s21 = sshll.u32 %s540_s20, 4  ;;  %p485_p2 = scmp.ne.s32.totalorder %s636_s3, %s484_s24  ;;  %s45_s21 = int_to_ptr.vmem [resolvable:$true] %s44_s21 }
  0x26   :  { %p488_p3 = scmp.lt.u32.totalorder %s484_s24, %s636_s3 }
  0x28   :  { %p490_p4 = pnand %p488_p3, %p485_p2 }
  0x2a   :  { %493 = shalt.err (!%p490_p4)
}
  0x2b   :  { %s494_s6 = scalar_lea.vmem %s45_s21, 2048  ;;  %p499_p6 = scmp.lt.s32.totalorder %s45_s21, %s45_s21 }
  0x2c   :  { %p495_p5 = scmp.ne.s32.totalorder %s45_s21, %s494_s6  ;;  %p500_p7 = scmp.lt.s32.totalorder %s494_s6, %s494_s6 }
  0x2e   :  { %p501_p8 = por %p500_p7, %p499_p6 }
  0x30   :  { %p502_p9 = pnand %p501_p8, %p495_p5 }
  0x32   :  { %505 = shalt.err (!%p502_p9)
}
  0x33   :  { %50 = dma.hbm_to_vmem [thread:$0]  %s636_s3, 2048, %s45_s21, [#allocation6], %s538_s1, %s538_s1, %s539_s17  }
  0x34   :  { %528 = dma.done.wait [#allocation3], 128  }
  0x35   :  { %529 = vsyncadd [#allocation3], 4294967168 }
  0x36   :  { %530 = dma.done.wait [#allocation6], 2560  }
  0x37   :  { %531 = vsyncadd [#allocation6], 4294964736  ;;  %v541_v0 = vmov 0   ;;  %v409_v1 = vld [vmem:[#allocation5 + $0x4] ss:$8 sps:$4 sm:$0xff]   ;;  %v415_v5 = vld [vmem:[#allocation2] sm:$0xff]   ;;  %v71_v22 = vlaneseq }
  0x38   :  { %142 = vmatprep.mubr.bf16.mxu0 %v541_v0  ;;  %v411_v2 = vld [vmem:[#allocation5] ss:$8 sps:$4 sm:$0xff]   ;;  %110 = vmatprep.subr.bf16.mxu0 %v409_v1  ;;  %v412_v3 = vld [vmem:[#allocation5 + $0x14] ss:$8 sps:$4 sm:$0xff]   ;;  %v414_v4 = vld [vmem:[#allocation5 + $0x10] ss:$8 sps:$4 sm:$0xff]  }
  0x39   :  { %111 = vmatpush1.bf16.msra.mxu0 %v411_v2  ;;  %v416_v6 = vld [vmem:[#allocation7 + $0x40] sm:$0xff]   ;;  %v418_v8 = vld [vmem:[#allocation7 + $0x48] sm:$0xff]   ;;  %vm106_vm0 = vcmask 261120   ;;  %v420_v10 = vld [vmem:[#allocation7 + $0x50] sm:$0xff]   ;;  %v72_v23 = vshrl.u32 %v71_v22, 7  ;;  %s542_s10 = smov [#allocation8]  }
  0x3a   :  { %112 = vmatprep.subr.bf16.mxu0 %v412_v3  ;;  %v417_v7 = vld [vmem:[#allocation7] sm:$0xff]   ;;  %378 = vmatprep.subr.bf16.mxu1 %v416_v6  ;;  %v419_v9 = vld [vmem:[#allocation7 + $0x8] sm:$0xff]   ;;  %v421_v11 = vld [vmem:[#allocation7 + $0x10] sm:$0xff]   ;;  %s342_s11 = sshll.u32 %s542_s10, 4  ;;  %s343_s11 = int_to_ptr.vmem [resolvable:$true] %s342_s11 }
  0x3b   :  { %379 = vmatpush3.bf16.msra.mxu1 %v417_v7  ;;  %v422_v12 = vld [vmem:[#allocation7 + $0x58] sm:$0xff]   ;;  %v424_v14 = vld [vmem:[#allocation7 + $0x60] sm:$0xff]   ;;  %v426_v16 = vld [vmem:[#allocation7 + $0x68] sm:$0xff]   ;;  %v73_v24 = vsub.s32 0, %v72_v23  ;;  %v77_v26 = vsub.s32 1, %v72_v23  ;;  %s506_s12 = scalar_lea.vmem %s343_s11, 256  ;;  %p511_p11 = scmp.lt.s32.totalorder %s343_s11, %s343_s11 }
  0x3c   :  { %380 = vmatprep.subr.bf16.mxu1 %v418_v8  ;;  %v423_v13 = vld [vmem:[#allocation7 + $0x18] sm:$0xff]   ;;  %v425_v15 = vld [vmem:[#allocation7 + $0x20] sm:$0xff]   ;;  %v427_v17 = vld [vmem:[#allocation7 + $0x28] sm:$0xff]   ;;  %p507_p10 = scmp.ne.s32.totalorder %s343_s11, %s506_s12  ;;  %p512_p12 = scmp.lt.s32.totalorder %s506_s12, %s506_s12 }
  0x3d   :  { %113 = vmatpush1.bf16.msra.mxu0 %v414_v4  ;;  %v428_v18 = vld [vmem:[#allocation7 + $0x70] sm:$0xff]   ;;  %v430_v20 = vld [vmem:[#allocation7 + $0x78] sm:$0xff]  }
  0x3e   :  { %v429_v19 = vld [vmem:[#allocation7 + $0x30] sm:$0xff]   ;;  %v431_v21 = vld [vmem:[#allocation7 + $0x38] sm:$0xff]   ;;  %p513_p13 = por %p512_p12, %p511_p11 }
  0x3f   :  { %381 = vmatpush3.bf16.msra.mxu1 %v419_v9  ;;  %v69_v25 = vld [vmem:[%s635_s2] sm:$0x3] }
  0x40   :  { %360 = vmatmul.mubr.msk.bf16.vlgmr.msra.gmra.mrb[0].mxu0 %vm106_vm0, %v415_v5  ;;  %382 = vmatprep.subr.bf16.mxu1 %v420_v10  ;;  %v74_v27 = vrot.slane %v69_v25, %v73_v24  ;;  %v78_v28 = vrot.slane %v69_v25, %v77_v26  ;;  %v361_v44 = vld [vmem:[%s637_s4] ss:$0 sm:$0xff]  ;;  %p514_p0 = pnand %p513_p13, %p507_p10 }
  0x43   :  { %383 = vmatpush3.bf16.msra.mxu1 %v421_v11 }
  0x44   :  { %384 = vmatprep.subr.bf16.mxu1 %v422_v12 }
  0x47   :  { %385 = vmatpush3.bf16.msra.mxu1 %v423_v13 }
  0x48   :  { %386 = vmatprep.subr.bf16.mxu1 %v424_v14 }
  0x4b   :  { %387 = vmatpush3.bf16.msra.mxu1 %v425_v15 }
  0x4c   :  { %388 = vmatprep.subr.bf16.mxu1 %v426_v16 }
  0x4f   :  { %389 = vmatpush3.bf16.msra.mxu1 %v427_v17 }
  0x50   :  { %390 = vmatprep.subr.bf16.mxu1 %v428_v18 }
  0x53   :  { %391 = vmatpush3.bf16.msra.mxu1 %v429_v19 }
  0x54   :  { %392 = vmatprep.subr.bf16.mxu1 %v430_v20 }
  0x57   :  { %393 = vmatpush3.bf16.msra.mxu1 %v431_v21 }
 0x113   :  { %v144_v29 = vpop.f32.mrb[0].mxu0 }
 0x114   :  { %v145_v30 = vadd.f32 %v144_v29, %v74_v27  ;;  %v146_v31 = vpop.f32.mrb[1].mxu0 }
 0x115   :  { %v147_v32 = vadd.f32 %v146_v31, %v78_v28  ;;  %v148_v33 = vpop.f32.mrb[2].mxu0 }
 0x116   :  { %432 = vtanh.f32 %v145_v30  ;;  %v149_v34 = vadd.f32 %v148_v33, %v74_v27  ;;  %v150_v35 = vpop.f32.mrb[3].mxu0 }
 0x117   :  { %434 = vtanh.f32 %v147_v32  ;;  %v151_v36 = vadd.f32 %v150_v35, %v78_v28 }
 0x118   :  { %436 = vtanh.f32 %v149_v34 }
 0x119   :  { %438 = vtanh.f32 %v151_v36 }
 0x120   :  { %v433_v37 = vpop.eup %432 }
 0x121   :  { %v435_v38 = vpop.eup %434 }
 0x122   :  { %v437_v39 = vpop.eup %436 }
 0x123   :  { %v439_v40 = vpop.eup %438  ;;  %v157_v41 = vpack.c.bf16 %v437_v39, %v433_v37 }
 0x124   :  { %v158_v42 = vpack.c.bf16 %v439_v40, %v435_v38 }
 0x126   :  { %326 = vmatprep.mubr.bf16.mxu1 %v158_v42 }
 0x127   :  { %327 = vmatmul.mubr.bf16.vlgmr.msra.gmra.mrb[0].mxu1 %v157_v41 }
 0x1fa   :  { %v394_v43 = vpop.f32.mrb[0].mxu1 }
 0x1fb   :  { %v395_v45 = vpop.f32.mrb[1].mxu1 }
 0x1fc   :  { %v396_v46 = vadd.f32 %v395_v45, %v394_v43  ;;  %v397_v47 = vpop.f32.mrb[2].mxu1 }
 0x1fd   :  { %v398_v48 = vpop.f32.mrb[3].mxu1 }
 0x1fe   :  { %v329_v49 = vadd.f32 %v396_v46, %v361_v44  ;;  %v399_v50 = vadd.f32 %v398_v48, %v397_v47 }
 0x200   :  { %335 = vst [vmem:[#allocation8] sm:$0xff] %v329_v49  ;;  %v332_v51 = vadd.f32 %v399_v50, %v361_v44 }
 0x202   :  { %336 = vst [vmem:[#allocation8 + $0x8] sm:$0xff] %v332_v51 }
 0x203   :  { %517 = shalt.err (!%p514_p0)
}
 0x204   :  { %s518_s14 = scalar_lea.hbm %s638_s5, 256 }
 0x205   :  { %p519_p1 = scmp.ne.s32.totalorder %s638_s5, %s518_s14  ;;  %p522_p2 = scmp.lt.u32.totalorder %s518_s14, %s638_s5 }
 0x207   :  { %p524_p3 = pnand %p522_p2, %p519_p1 }
 0x209   :  { %527 = shalt.err (!%p524_p3)
}
 0x20a   :  { %348 = dma.vmem_to_hbm [thread:$0]  %s343_s11, 256, %s638_s5, [#allocation4], %s535_s28, %s535_s28, %s536_s29  }
 0x20b   :  { %532 = dma.done.wait [#allocation4], 256  }
 0x20c   :  { %533 = vsyncadd [#allocation4], 4294967040 }
 0x20d   :  { %352 = vsyncpa [#allocation3], 1 }
 0x20e   :  { %353 = vsyncpa [#allocation6], 1 }
 0x20f   :  { %354 = vsyncpa [#allocation4], 1 }

</bundles_post_ra>
